<compile_context>
chip_gen: v7x
topology: tpu7x:2x2x1
jax: 0.10.0
libtpu: 0.0.40
codegen_flags: <defaults>
</compile_context>

<pallas_src>
import jax
import jax.numpy as jnp
from jax.experimental import pallas as pl
from jax.experimental.pallas import tpu as pltpu


def _spatial_dropout_kernel(x_ref, m_ref, o_ref):
    """o = x * mask, mask broadcast over the sequence (sublane) axis.

    x_ref : VMEM (Bt, St, C)  input tile
    m_ref : VMEM (Bt, 1,  C)  per-(batch, channel) scale: 0 or 1/(1-p)
    o_ref : VMEM (Bt, St, C)  output tile
    """
    o_ref[...] = x_ref[...] * m_ref[...]


def _choose_tiles(B, S, C, itemsize, budget_bytes=4 << 20):
    """Pick (Bt, St) so one block is ~budget_bytes and divides (B, S) evenly."""
    row_bytes = max(1, S * C * itemsize)
    if row_bytes <= budget_bytes:
        # Full-S blocks; pack as many batch rows as fit the budget.
        bt = min(B, max(1, budget_bytes // row_bytes))
        while B % bt:
            bt -= 1
        return bt, S
    # One batch row per block; tile S in sublane-aligned chunks.
    sub = {4: 8, 2: 16, 1: 32}.get(itemsize, 8)
    st = max(sub, (budget_bytes // (C * itemsize)) // sub * sub)
    st = min(st, S)
    while st > sub and S % st:
        st -= sub
    if S % st:
        st = S  # ragged S: fall back to full-S blocks (stays correct)
    return 1, st


def spatial_dropout(x, p, key, *, training=True):
    """x: (B, S, C). Drops entire channels per batch element (SpatialDropout)."""
    if not training or p == 0.0:
        return x
    if p >= 1.0:
        return jnp.zeros_like(x)

    B, S, C = x.shape
    scale = 1.0 / (1.0 - p)
    # Per-(batch, channel) keep mask, pre-scaled: 0 for dropped, 1/(1-p) for kept.
    keep = jax.random.bernoulli(key, 1.0 - p, (B, 1, C))
    mask = keep.astype(x.dtype) * jnp.asarray(scale, dtype=x.dtype)

    bt, st = _choose_tiles(B, S, C, jnp.dtype(x.dtype).itemsize)
    grid = (B // bt, S // st)

    # NOTE: C < 128 lowers to masked partial stores; callers with small C should
    # pad the channel dim to a multiple of 128 upstream for a lane-dense store.
    return pl.pallas_call(
        _spatial_dropout_kernel,
        out_shape=jax.ShapeDtypeStruct((B, S, C), x.dtype),
        grid=grid,
        in_specs=[
            pl.BlockSpec((bt, st, C), lambda b, s: (b, s, 0)),   # x tile
            pl.BlockSpec((bt, 1, C), lambda b, s: (b, 0, 0)),    # mask tile
        ],
        out_specs=pl.BlockSpec((bt, st, C), lambda b, s: (b, s, 0)),
        compiler_params=pltpu.CompilerParams(
            # Mask is precomputed -> steps are independent; shard across TCs.
            dimension_semantics=("parallel", "parallel"),
        ),
    )(x, mask)


if __name__ == "__main__":
    key = jax.random.PRNGKey(0)
    kx, km = jax.random.split(key)

    B, S, C = 2, 8, 32          # (batch, seq, hidden) — SpatialDropout's layout
    x = jax.random.normal(kx, (B, S, C), dtype=jnp.float32)
    p = 0.3

    y = spatial_dropout(x, p, km, training=True)
    y = jax.block_until_ready(y)

    x_np = jax.device_get(x)
    y_np = jax.device_get(y)
    scale = 1.0 / (1.0 - p)

    # 1) each (batch, channel) slice is either all-zero or exactly x * 1/(1-p)
    dropped = (y_np == 0.0).all(axis=1)                       # (B, C)
    expected = jnp.where(dropped[:, None, :], 0.0, x_np * scale)
    assert jnp.allclose(y_np, expected, rtol=1e-5, atol=1e-5)

    # 2) eval mode is the identity
    ident = spatial_dropout(x, p, km, training=False)
    assert jnp.array_equal(ident, x)

    print("KERNEL_OK")
</pallas_src>

<mosaic_0001>
module attributes {stable_mosaic.version = 11 : i64} {
  func.func @_spatial_dropout_kernel(%arg0: i32, %arg1: i32, %arg2: memref<2x8x32xf32, #tpu.memory_space<vmem>>, %arg3: memref<2x1x32xf32, #tpu.memory_space<vmem>>, %arg4: memref<2x8x32xf32, #tpu.memory_space<vmem>>) attributes {dimension_semantics = [#tpu.dimension_semantics<parallel>, #tpu.dimension_semantics<parallel>], iteration_bounds = array<i64: 1, 1>, scalar_prefetch = 0 : i64, scratch_operands = 0 : i64, tpu.core_type = #tpu.core_type<tc>, window_params = [{transform_indices = @transform_0, window_bounds = array<i64: 2, 8, 32>}, {transform_indices = @transform_1, window_bounds = array<i64: 2, 1, 32>}, {transform_indices = @transform_2, window_bounds = array<i64: 2, 8, 32>}]} {
    %c0 = arith.constant 0 : index
    %c0_0 = arith.constant 0 : index
    %c0_1 = arith.constant 0 : index
    %0 = vector.load %arg2[%c0, %c0_0, %c0_1] : memref<2x8x32xf32, #tpu.memory_space<vmem>>, vector<2x8x32xf32>
    %c0_2 = arith.constant 0 : index
    %c0_3 = arith.constant 0 : index
    %c0_4 = arith.constant 0 : index
    %1 = vector.load %arg3[%c0_2, %c0_3, %c0_4] : memref<2x1x32xf32, #tpu.memory_space<vmem>>, vector<2x1x32xf32>
    %2 = vector.broadcast %1 : vector<2x1x32xf32> to vector<2x8x32xf32>
    %3 = arith.mulf %0, %2 : vector<2x8x32xf32>
    %c0_5 = arith.constant 0 : index
    %c0_6 = arith.constant 0 : index
    %c0_7 = arith.constant 0 : index
    %4 = vector.load %arg4[%c0_5, %c0_6, %c0_7] : memref<2x8x32xf32, #tpu.memory_space<vmem>>, vector<2x8x32xf32>
    tpu.vector_store %arg4[%c0_5, %c0_6, %c0_7], %3 {strides = array<i32>} : memref<2x8x32xf32, #tpu.memory_space<vmem>>, vector<2x8x32xf32>,
    return
  }
  func.func @transform_0(%arg0: i32, %arg1: i32) -> (i32, i32, i32) {
    %c0_i32 = arith.constant 0 : i32
    %c0_i32_0 = arith.constant 0 : i32
    return %arg0, %arg1, %c0_i32 : i32, i32, i32
  }
  func.func @transform_1(%arg0: i32, %arg1: i32) -> (i32, i32, i32) {
    %c0_i32 = arith.constant 0 : i32
    %c0_i32_0 = arith.constant 0 : i32
    %c0_i32_1 = arith.constant 0 : i32
    return %arg0, %c0_i32, %c0_i32_0 : i32, i32, i32
  }
  func.func @transform_2(%arg0: i32, %arg1: i32) -> (i32, i32, i32) {
    %c0_i32 = arith.constant 0 : i32
    %c0_i32_0 = arith.constant 0 : i32
    return %arg0, %arg1, %c0_i32 : i32, i32, i32
  }
}

</mosaic_0001>

<bundles_post_ra>
// kernel: tpu_custom_call.1
= control target key start
LH: loop header
LB: loop body
LE: loop exit
PB: predicated region body
PF: predicated region fallthrough
CT: control target
= control target key end

     0   :  { %7 = vsyncpa [#allocation3], 0  ;;  %s173_s0 = inlined_call_operand.hbm [shape: f32[2,8,32], index: 0, kind: input, shape index: {}]   ;;  %s174_s1 = inlined_call_operand.vmem [shape: f32[2,1,32], index: 1, kind: input, shape index: {}]   ;;  %s175_s2 = inlined_call_operand.hbm [shape: f32[2,8,32], index: 2, kind: output, shape index: {}]  }
   0x1   :  { %8 = vsyncpa [#allocation4], 0  ;;  %s118_s9 = smov [#allocation2]   ;;  %s70_s13 = scalar_lea.hbm %s173_s0, 256 }
   0x2   :  { %s14_s10 = sshll.u32 %s118_s9, 4  ;;  %p71_p0 = scmp.ne.s32.totalorder %s173_s0, %s70_s13  ;;  %s15_s10 = int_to_ptr.vmem [resolvable:$true] %s14_s10 }
   0x3   :  { %p74_p1 = scmp.lt.u32.totalorder %s70_s13, %s173_s0 }
   0x5   :  { %p76_p2 = pnand %p74_p1, %p71_p0 }
   0x7   :  { %79 = shalt.err (!%p76_p2)
}
   0x8   :  { %s80_s18 = scalar_lea.vmem %s15_s10, 256  ;;  %p85_p4 = scmp.lt.s32.totalorder %s15_s10, %s15_s10 }
   0x9   :  { %p81_p3 = scmp.ne.s32.totalorder %s15_s10, %s80_s18  ;;  %p86_p5 = scmp.lt.s32.totalorder %s80_s18, %s80_s18 }
   0xb   :  { %p87_p6 = por %p86_p5, %p85_p4 }
   0xd   :  { %p88_p7 = pnand %p87_p6, %p81_p3 }
   0xf   :  { %91 = shalt.err (!%p88_p7)
}
  0x10   :  { %s119_s19 = smov 128   ;;  %s120_s20 = smov 8  }
  0x11   :  { %20 = dma.hbm_to_vmem [thread:$0]  %s173_s0, 256, %s15_s10, [#allocation3], %s119_s19, %s119_s19, %s120_s20  }
  0x12   :  { %114 = dma.done.wait [#allocation3], 256  }
  0x13   :  { %115 = vsyncadd [#allocation3], 4294967040  ;;  %s121_s23 = smov [#allocation5]   ;;  %v26_v0 = vld [vmem:[#allocation2] sm:$0xff]  ;;  %vm44_vm0 = vcmask 261120   ;;  %v27_v2 = vld [vmem:[#allocation2 + $0x8] sm:$0xff] }
  0x14   :  { %s52_s24 = sshll.u32 %s121_s23, 4  ;;  %v64_v1 = vld [vmem:[%s174_s1] ss:$0 sm:$0xff]  ;;  %v65_v4 = vld [vmem:[%s174_s1 + $0x1] ss:$0 sm:$0xff]  ;;  %s53_s24 = int_to_ptr.vmem [resolvable:$true] %s52_s24 }
  0x15   :  { %v42_v3 = vmul.f32 %v64_v1, %v26_v0  ;;  %v43_v5 = vmul.f32 %v65_v4, %v27_v2  ;;  %s92_s0 = scalar_lea.vmem %s53_s24, 256  ;;  %p97_p9 = scmp.lt.s32.totalorder %s53_s24, %s53_s24 }
  0x16   :  { %p93_p8 = scmp.ne.s32.totalorder %s53_s24, %s92_s0  ;;  %p98_p10 = scmp.lt.s32.totalorder %s92_s0, %s92_s0 }
  0x17   :  { %45 = vst.msk [vmem:[#allocation5] sm:$0xff] %vm44_vm0, %v42_v3  ;;  %46 = vst.msk [vmem:[#allocation5 + $0x8] sm:$0xff] %vm44_vm0, %v43_v5 }
  0x18   :  { %p99_p11 = por %p98_p10, %p97_p9 }
  0x1a   :  { %p100_p12 = pnand %p99_p11, %p93_p8 }
  0x1c   :  { %103 = shalt.err (!%p100_p12)
}
  0x1d   :  { %s104_s3 = scalar_lea.hbm %s175_s2, 256 }
  0x1e   :  { %p105_p13 = scmp.ne.s32.totalorder %s175_s2, %s104_s3  ;;  %p108_p0 = scmp.lt.u32.totalorder %s104_s3, %s175_s2 }
  0x20   :  { %p110_p1 = pnand %p108_p0, %p105_p13 }
  0x22   :  { %113 = shalt.err (!%p110_p1)
}
  0x23   :  { %58 = dma.vmem_to_hbm [thread:$0]  %s53_s24, 256, %s175_s2, [#allocation4], %s119_s19, %s119_s19, %s120_s20  }
  0x24   :  { %116 = dma.done.wait [#allocation4], 256  }
  0x25   :  { %117 = vsyncadd [#allocation4], 4294967040 }
  0x26   :  { %62 = vsyncpa [#allocation3], 1 }
  0x27   :  { %63 = vsyncpa [#allocation4], 1 }

</bundles_post_ra>
